<compile_context>
chip_gen: v5e
topology: v5e:2x2
jax: 0.10.0
libtpu: 0.0.40
codegen_flags: <defaults>
</compile_context>

<pallas_src>
import functools

import jax
import jax.numpy as jnp
from jax import lax
from jax.experimental import pallas as pl
from jax.experimental.pallas import tpu as pltpu

LANE = 128
OUT_PAD = LANE  # lane-dense padded width of the edge-score output


def _round_up(x, m):
    return ((x + m - 1) // m) * m


def _pad2d(a, rows, cols):
    r, c = a.shape
    return jnp.pad(a, ((0, rows - r), (0, cols - c)))


def _vmem_capacity_bytes():
    try:
        return int(pltpu.get_tpu_info().vmem_capacity_bytes)
    except Exception:
        return 128 * 2**20


def _vmem_limit(working_set_bytes):
    cap = _vmem_capacity_bytes()
    budget = int(cap * 0.65)  # ~44 MiB on 64 MiB v7x, ~83 MiB on 128 MiB v5e/v6e
    return int(min(budget, max(32 * 2**20, 2 * int(working_set_bytes))))


def _pick_tile(n, target):
    """Largest lane-multiple tile <= target that minimizes N padding."""
    best_t, best_pad = LANE, _round_up(n, LANE)
    for t in range(LANE, target + 1, LANE):
        p = _round_up(n, t)
        if p <= best_pad:
            best_t, best_pad = t, p
    return best_t, best_pad


# ----------------------------------------------------------------------------
# Prologue (pure JAX, runs once): normalized adjacency.
# ----------------------------------------------------------------------------
def normalized_adjacency(adj01, adjw):
    """A_norm = D_in^{-1/2} * A_w * D_out^{-1/2} (DGL norm='both', structural degrees).

    adj[i, j] = weight of edge j -> i (self-loops already included).
    """
    out_deg = jnp.sum(adj01, axis=0)
    in_deg = jnp.sum(adj01, axis=1)
    norm_src = lax.rsqrt(jnp.maximum(out_deg, 1.0))[None, :]
    norm_dst = lax.rsqrt(jnp.maximum(in_deg, 1.0))[:, None]
    return (norm_dst * adjw * norm_src).astype(jnp.float32)


# ----------------------------------------------------------------------------
# Kernel 1: row-parallel dense stack (affine / GCN weight projection).
# ----------------------------------------------------------------------------
def _dense_stack_kernel(*refs, specs, matmul_dtype):
    # refs = (x, w0, [b0], w1, [b1], ..., out); specs[l] = (has_bias, relu)
    x_ref, out_ref = refs[0], refs[-1]
    pos = 1
    h = x_ref[...]
    for (has_bias, apply_relu) in specs:
        w = refs[pos][...]
        pos += 1
        h = jnp.dot(h.astype(matmul_dtype), w, preferred_element_type=jnp.float32)
        if has_bias:
            h = h + refs[pos][...]
            pos += 1
        if apply_relu:
            h = jnp.maximum(h, 0.0)
    out_ref[...] = h.astype(out_ref.dtype)


def dense_stack(x_p, ops, *, tm, matmul_dtype, out_dtype):
    """ops: list of (w_p [Fin_p, Fout_p] matmul_dtype, b_p [1, Fout_p] f32 | None, relu)."""
    n_pad, f0 = x_p.shape
    specs, args, in_specs = [], [x_p], [pl.BlockSpec((tm, f0), lambda i: (i, 0))]
    for (w_p, b_p, relu) in ops:
        args.append(w_p)
        in_specs.append(pl.BlockSpec(w_p.shape, lambda i: (0, 0)))
        if b_p is not None:
            args.append(b_p)
            in_specs.append(pl.BlockSpec(b_p.shape, lambda i: (0, 0)))
        specs.append((b_p is not None, bool(relu)))
    f_out = ops[-1][0].shape[1]

    resident = sum(int(a.size) * a.dtype.itemsize for a in args[1:])
    ws = (2 * tm * f0 * x_p.dtype.itemsize + resident
          + 2 * tm * f_out * jnp.dtype(out_dtype).itemsize
          + tm * max(f0, f_out) * 4)
    flops, fin = 0, f0
    for (w_p, _, _) in ops:
        flops += 2 * n_pad * fin * w_p.shape[1]
        fin = w_p.shape[1]
    bytes_accessed = (sum(int(a.size) * a.dtype.itemsize for a in args)
                      + n_pad * f_out * jnp.dtype(out_dtype).itemsize)

    return pl.pallas_call(
        functools.partial(_dense_stack_kernel, specs=tuple(specs),
                          matmul_dtype=matmul_dtype),
        out_shape=jax.ShapeDtypeStruct((n_pad, f_out), out_dtype),
        grid_spec=pltpu.PrefetchScalarGridSpec(
            num_scalar_prefetch=0,
            grid=(n_pad // tm,),
            in_specs=in_specs,
            out_specs=pl.BlockSpec((tm, f_out), lambda i: (i, 0))),
        compiler_params=pltpu.CompilerParams(
            dimension_semantics=("parallel",),
            vmem_limit_bytes=_vmem_limit(ws)),
        cost_estimate=pl.CostEstimate(flops=int(flops), transcendentals=0,
                                      bytes_accessed=int(bytes_accessed)),
    )(*args)


# ----------------------------------------------------------------------------
# Kernel 2: GraphConv aggregation, tiled (dst rows x src reduction).
# ----------------------------------------------------------------------------
def _aggregate_kernel(*refs, has_w, apply_relu, matmul_dtype):
    if has_w:
        a_ref, h_ref, w_ref, b_ref, out_ref, acc_ref = refs
    else:
        a_ref, h_ref, b_ref, out_ref, acc_ref = refs
        w_ref = None
    k = pl.program_id(1)

    @pl.when(k == 0)
    def _():
        acc_ref[...] = jnp.zeros_like(acc_ref)

    acc_ref[...] += jnp.dot(a_ref[...], h_ref[...],
                            preferred_element_type=jnp.float32)

    @pl.when(k == pl.num_programs(1) - 1)
    def _():
        r = acc_ref[...]
        if has_w:
            r = jnp.dot(r.astype(matmul_dtype), w_ref[...],
                        preferred_element_type=jnp.float32)
        r = r + b_ref[...]
        if apply_relu:
            r = jnp.maximum(r, 0.0)
        out_ref[...] = r.astype(out_ref.dtype)


def gcn_aggregate(a_p, h_p, w_p, b_p, *, apply_relu, tile, matmul_dtype, out_dtype):
    """out = relu?((A @ H) [@ W] + b).  w_p is None if H was pre-projected."""
    n_pad = a_p.shape[0]
    fh = h_p.shape[1]
    has_w = w_p is not None
    fout = w_p.shape[1] if has_w else fh
    tm = tk = tile
    grid = (n_pad // tm, n_pad // tk)

    in_specs = [pl.BlockSpec((tm, tk), lambda i, k: (i, k)),
                pl.BlockSpec((tk, fh), lambda i, k: (k, 0))]
    args = [a_p, h_p]
    if has_w:
        in_specs.append(pl.BlockSpec(w_p.shape, lambda i, k: (0, 0)))
        args.append(w_p)
    in_specs.append(pl.BlockSpec(b_p.shape, lambda i, k: (0, 0)))
    args.append(b_p)

    ws = (2 * tm * tk * a_p.dtype.itemsize + 2 * tk * fh * h_p.dtype.itemsize
          + (int(w_p.size) * w_p.dtype.itemsize if has_w else 0)
          + int(b_p.size) * 4
          + 2 * tm * fout * jnp.dtype(out_dtype).itemsize
          + tm * fh * 4)
    flops = 2 * n_pad * n_pad * fh + (2 * n_pad * fh * fout if has_w else 0)
    bytes_accessed = (int(a_p.size) * a_p.dtype.itemsize
                      + grid[0] * int(h_p.size) * h_p.dtype.itemsize
                      + (int(w_p.size) * w_p.dtype.itemsize if has_w else 0)
                      + n_pad * fout * jnp.dtype(out_dtype).itemsize)

    return pl.pallas_call(
        functools.partial(_aggregate_kernel, has_w=has_w,
                          apply_relu=bool(apply_relu), matmul_dtype=matmul_dtype),
        out_shape=jax.ShapeDtypeStruct((n_pad, fout), out_dtype),
        grid_spec=pltpu.PrefetchScalarGridSpec(
            num_scalar_prefetch=0, grid=grid,
            in_specs=in_specs,
            out_specs=pl.BlockSpec((tm, fout), lambda i, k: (i, 0)),
            scratch_shapes=[pltpu.VMEM((tm, fh), jnp.float32)]),
        compiler_params=pltpu.CompilerParams(
            dimension_semantics=("parallel", "arbitrary"),
            vmem_limit_bytes=_vmem_limit(ws)),
        cost_estimate=pl.CostEstimate(flops=int(flops), transcendentals=0,
                                      bytes_accessed=int(bytes_accessed)),
    )(*args)


# ----------------------------------------------------------------------------
# Embedding driver: pre-affine + GraphConv layers via the two kernels above.
# ----------------------------------------------------------------------------
def gcn_embedding(a_norm, x, layers, *, matmul_dtype=jnp.bfloat16):
    """layers: list of (W [Fin,Fout], b [Fout], is_gcn, apply_relu), forward order.

    Returns the padded [n_pad, Fout_pad] f32 embedding (slice in the caller)."""
    n = x.shape[0]
    vmem_cap = _vmem_capacity_bytes()
    tile_target = 512 if vmem_cap > 96 * 2**20 else 256   # v5e/v6e vs v7x
    tile, n_pad = _pick_tile(n, tile_target)

    a_p = _pad2d(a_norm.astype(jnp.float32), n_pad, n_pad).astype(matmul_dtype)

    h_dtype = matmul_dtype  # inter-layer activations (halves HBM traffic)
    f0_pad = _round_up(x.shape[1], LANE)
    h = _pad2d(x.astype(jnp.float32), n_pad, f0_pad).astype(h_dtype)

    def pad_w(w):
        return _pad2d(w.astype(jnp.float32),
                      _round_up(w.shape[0], LANE),
                      _round_up(w.shape[1], LANE)).astype(matmul_dtype)

    def pad_b(b):
        return _pad2d(b.reshape(1, -1).astype(jnp.float32), 1,
                      _round_up(b.shape[0], LANE))

    pending = []  # dense ops to flush right before the next aggregation
    n_layers = len(layers)
    for li, (w, b, is_gcn, relu) in enumerate(layers):
        last = (li == n_layers - 1)
        if not is_gcn:
            pending.append((pad_w(w), pad_b(b), bool(relu)))
            continue
        project_first = w.shape[0] > w.shape[1]  # decided on TRUE dims
        if project_first:
            pending.append((pad_w(w), None, False))  # h @ W first, then A @ (.)
            w_for_agg = None
        else:
            w_for_agg = pad_w(w)                      # (A @ h) @ W in the finalize
        if pending:
            h = dense_stack(h, pending, tm=tile, matmul_dtype=matmul_dtype,
                            out_dtype=h_dtype)
            pending = []
        out_dtype = jnp.float32 if last else h_dtype
        h = gcn_aggregate(a_p, h, w_for_agg, pad_b(b), apply_relu=relu,
                          tile=tile, matmul_dtype=matmul_dtype,
                          out_dtype=out_dtype)
    if pending:  # trailing dense layers (not present in this model)
        h = dense_stack(h, pending, tm=tile, matmul_dtype=matmul_dtype,
                        out_dtype=jnp.float32)
    return h


# ----------------------------------------------------------------------------
# Kernel 3: edge MLP with fused triplet gather (DMA gather from HBM).
# ----------------------------------------------------------------------------
def _edge_mlp_kernel(*refs, n_hidden, te, matmul_dtype):
    # refs = (idx_smem, emb_hbm, w1s, w1d, b1, (wh, bh)*n_hidden, w_out_row, b_out,
    #         out_ref, s_buf, d_buf, sem)
    idx_ref, emb_hbm = refs[0], refs[1]
    w1s_ref, w1d_ref, b1_ref = refs[2], refs[3], refs[4]
    pos = 5
    hidden = []
    for _ in range(n_hidden):
        hidden.append((refs[pos], refs[pos + 1]))
        pos += 2
    w_out_ref, b_out_ref = refs[pos], refs[pos + 1]
    out_ref = refs[pos + 2]
    s_buf, d_buf, sem = refs[pos + 3], refs[pos + 4], refs[pos + 5]

    e0 = pl.program_id(0) * te

    # Gather src/dst embedding rows for this edge tile straight from HBM
    # (indices come from the scalar-prefetched triplet table in SMEM).
    @pl.loop(0, te)
    def _start(r):
        si = idx_ref[0, e0 + r]
        di = idx_ref[1, e0 + r]
        pltpu.make_async_copy(emb_hbm.at[pl.ds(si, 1), :],
                              s_buf.at[pl.ds(r, 1), :], sem.at[0]).start()
        pltpu.make_async_copy(emb_hbm.at[pl.ds(di, 1), :],
                              d_buf.at[pl.ds(r, 1), :], sem.at[1]).start()

    @pl.loop(0, te)
    def _wait(r):
        pltpu.make_async_copy(emb_hbm.at[pl.ds(0, 1), :],
                              s_buf.at[pl.ds(r, 1), :], sem.at[0]).wait()
        pltpu.make_async_copy(emb_hbm.at[pl.ds(0, 1), :],
                              d_buf.at[pl.ds(r, 1), :], sem.at[1]).wait()

    # cat(s, d) @ W1 == s @ W1[:F] + d @ W1[F:]  (no in-kernel concat)
    t = (jnp.dot(s_buf[...].astype(matmul_dtype), w1s_ref[...],
                 preferred_element_type=jnp.float32)
         + jnp.dot(d_buf[...].astype(matmul_dtype), w1d_ref[...],
                   preferred_element_type=jnp.float32)
         + b1_ref[...])
    for (wh_ref, bh_ref) in hidden:
        t = jnp.maximum(
            jnp.dot(t.astype(matmul_dtype), wh_ref[...],
                    preferred_element_type=jnp.float32) + bh_ref[...], 0.0)
    # Final Linear(h, 1): true out dim is 1 -> VPU multiply + XLU lane reduce
    # instead of a 99%-padding MXU pass; store stays lane-dense.
    val = jnp.sum(t * w_out_ref[...], axis=-1, keepdims=True) + b_out_ref[0, 0]
    out_ref[...] = jnp.broadcast_to(val, out_ref.shape).astype(out_ref.dtype)


def mlp_edge_predictor(emb_padded, src_idx, dst_idx, params, *,
                       matmul_dtype=jnp.bfloat16):
    n_pad, f_pad = emb_padded.shape
    e = int(src_idx.shape[0])
    te = 128
    e_pad = _round_up(max(e, 1), te)

    idx = jnp.zeros((2, e_pad), jnp.int32)
    idx = idx.at[0, :e].set(src_idx.astype(jnp.int32))
    idx = idx.at[1, :e].set(dst_idx.astype(jnp.int32))

    f = params["w_cat"].shape[0] // 2
    h_pad = _round_up(params["w_cat"].shape[1], LANE)
    w_cat = params["w_cat"].astype(jnp.float32)
    w1s = _pad2d(w_cat[:f], f_pad, h_pad).astype(matmul_dtype)
    w1d = _pad2d(w_cat[f:], f_pad, h_pad).astype(matmul_dtype)
    b1 = _pad2d(params["b_cat"].reshape(1, -1).astype(jnp.float32), 1, h_pad)

    args = [idx, emb_padded, w1s, w1d, b1]
    in_specs = [pl.BlockSpec(memory_space=pl.ANY),             # embedding stays in HBM
                pl.BlockSpec(w1s.shape, lambda t, s: (0, 0)),  # weights VMEM-resident
                pl.BlockSpec(w1d.shape, lambda t, s: (0, 0)),
                pl.BlockSpec(b1.shape, lambda t, s: (0, 0))]
    for (w, b) in params["hidden"]:
        wp = _pad2d(w.astype(jnp.float32), h_pad, h_pad).astype(matmul_dtype)
        bp = _pad2d(b.reshape(1, -1).astype(jnp.float32), 1, h_pad)
        args += [wp, bp]
        in_specs += [pl.BlockSpec(wp.shape, lambda t, s: (0, 0)),
                     pl.BlockSpec(bp.shape, lambda t, s: (0, 0))]
    w_out_row = _pad2d(params["w_out"].astype(jnp.float32).reshape(1, -1), 1, h_pad)
    b_out = params["b_out"].astype(jnp.float32).reshape(1, 1)
    args += [w_out_row, b_out]
    in_specs += [pl.BlockSpec(w_out_row.shape, lambda t, s: (0, 0)),
                 pl.BlockSpec(memory_space=pltpu.MemorySpace.SMEM)]

    n_hidden = len(params["hidden"])
    weight_bytes = sum(int(a.size) * a.dtype.itemsize for a in args[2:])
    ws = (weight_bytes + 2 * te * f_pad * emb_padded.dtype.itemsize
          + 2 * te * OUT_PAD * 4 + 2 * te * h_pad * 4)
    flops = (4 * e_pad * f_pad * h_pad + 2 * e_pad * h_pad * h_pad * n_hidden
             + 2 * e_pad * h_pad)
    bytes_accessed = (2 * e_pad * f_pad * emb_padded.dtype.itemsize + weight_bytes
                      + e_pad * OUT_PAD * 4 + int(idx.size) * 4)

    out = pl.pallas_call(
        functools.partial(_edge_mlp_kernel, n_hidden=n_hidden, te=te,
                          matmul_dtype=matmul_dtype),
        out_shape=jax.ShapeDtypeStruct((e_pad, OUT_PAD), jnp.float32),
        grid_spec=pltpu.PrefetchScalarGridSpec(
            num_scalar_prefetch=1,
            grid=(e_pad // te,),
            in_specs=in_specs,
            out_specs=pl.BlockSpec((te, OUT_PAD), lambda t, s: (t, 0)),
            scratch_shapes=[pltpu.VMEM((te, f_pad), emb_padded.dtype),
                            pltpu.VMEM((te, f_pad), emb_padded.dtype),
                            pltpu.SemaphoreType.DMA((2,))]),
        compiler_params=pltpu.CompilerParams(
            dimension_semantics=("parallel",),
            vmem_limit_bytes=_vmem_limit(ws)),
        cost_estimate=pl.CostEstimate(flops=int(flops), transcendentals=0,
                                      bytes_accessed=int(bytes_accessed)),
    )(*args)
    return out[:e, :1]


# ----------------------------------------------------------------------------
# Model classes (deterministic init; forward matches the PyTorch module).
# ----------------------------------------------------------------------------
def glorot(key, shape):
    fan_in, fan_out = shape
    limit = (6.0 / (fan_in + fan_out)) ** 0.5
    return jax.random.uniform(key, shape, jnp.float32, -limit, limit)


class GCN:
    """JAX port of the PyTorch/DGL GCN module (layers stored in forward order)."""

    def __init__(self, in_feats, h_feats, out_feat=500, layer_num=1, *, key):
        self.layer_num = layer_num
        keys = jax.random.split(key, layer_num + 2)
        k = 0
        self.layers = []  # (W, b, apply_relu)
        if layer_num > 1:   # in_layer: GraphConv(in_feats, h_feats, relu)
            self.layers.append((glorot(keys[k], (in_feats, h_feats)),
                                jnp.zeros((h_feats,), jnp.float32), True))
        else:               # in_layer: GraphConv(in_feats, out_feat, None)
            self.layers.append((glorot(keys[k], (in_feats, out_feat)),
                                jnp.zeros((out_feat,), jnp.float32), False))
        k += 1
        for _ in range(layer_num - 2):   # hidden: GraphConv(h_feats, out_feat, relu)
            self.layers.append((glorot(keys[k], (h_feats, out_feat)),
                                jnp.zeros((out_feat,), jnp.float32), True))
            k += 1
        if layer_num >= 2:               # last: GraphConv(h_feats, out_feat, None)
            self.layers.append((glorot(keys[k], (h_feats, out_feat)),
                                jnp.zeros((out_feat,), jnp.float32), False))
            k += 1


class Encoder:
    """JAX/Pallas port of the PyTorch Encoder forward pass."""

    def __init__(self, features, GCN_in_dim=500, gcn_dim=500, h_mlp_dim=500,
                 use_pre_linearAffine=True, use_MLP_edgepredictor=True, *,
                 key, matmul_dtype=jnp.bfloat16):
        assert use_MLP_edgepredictor, (
            "only the MLP_edge_predictor (default) head is implemented")
        self.use_pre_linearAffine = use_pre_linearAffine
        self.matmul_dtype = matmul_dtype
        k_aff, k_gcn, k1, k2 = jax.random.split(key, 4)
        # LinearAffine(feat_dim, GCN_in_dim): y = x @ W + b
        self.affine_w = glorot(k_aff, (features.shape[1], GCN_in_dim))
        self.affine_b = jnp.zeros((GCN_in_dim,), jnp.float32)
        # GCN(GCN_in_dim, gcn_dim, gcn_dim) with default layer_num=1
        self.gcn = GCN(GCN_in_dim, gcn_dim, gcn_dim, key=k_gcn)
        # MLP_edge_predictor(gcn_dim, h_mlp_dim), default layer_num=2 (no hidden)
        self.pred = dict(
            w_cat=glorot(k1, (2 * gcn_dim, h_mlp_dim)),
            b_cat=jnp.zeros((h_mlp_dim,), jnp.float32),
            hidden=[],
            w_out=glorot(k2, (h_mlp_dim, 1)),
            b_out=jnp.zeros((1,), jnp.float32),
        )

    def forward(self, adj01, adjw, feats, triplets, use_weighted_edge):
        # g = dgl.add_self_loop(g): adjacency inputs already include self-loops.
        a_w = adjw if use_weighted_edge else adj01
        a_norm = normalized_adjacency(adj01, a_w)      # f32, once for all layers

        layers = []
        if self.use_pre_linearAffine:
            layers.append((self.affine_w, self.affine_b, False, False))
        for (w, b, relu) in self.gcn.layers:
            layers.append((w, b, True, relu))

        emb_pad = gcn_embedding(a_norm, feats, layers,
                                matmul_dtype=self.matmul_dtype)
        n = feats.shape[0]
        gcn_dim = self.gcn.layers[-1][0].shape[1]
        embedding = emb_pad[:n, :gcn_dim]
        # Triplet gather is fused into the edge-MLP kernel (DMA gather from HBM).
        weights = mlp_edge_predictor(emb_pad, triplets[:, 0], triplets[:, 2],
                                     self.pred, matmul_dtype=self.matmul_dtype)
        return weights, embedding


# ----------------------------------------------------------------------------
# Pure-JAX reference (for a loose tolerance check against the bf16 kernels).
# ----------------------------------------------------------------------------
def reference_forward(enc, adj01, adjw, feats, triplets, use_weighted_edge):
    a_w = adjw if use_weighted_edge else adj01
    a_norm = normalized_adjacency(adj01, a_w)
    h = feats.astype(jnp.float32)
    if enc.use_pre_linearAffine:
        h = h @ enc.affine_w + enc.affine_b
    for (w, b, relu) in enc.gcn.layers:
        h = a_norm @ (h @ w) + b
        if relu:
            h = jnp.maximum(h, 0.0)
    emb = h
    s = emb[triplets[:, 0]]
    o = emb[triplets[:, 2]]
    t = jnp.concatenate([s, o], axis=1) @ enc.pred["w_cat"] + enc.pred["b_cat"]
    for (w, b) in enc.pred["hidden"]:
        t = jnp.maximum(t @ w + b, 0.0)
    wts = t @ enc.pred["w_out"] + enc.pred["b_out"]
    return wts, emb


if __name__ == "__main__":
    key = jax.random.PRNGKey(0)
    k_graph, k_wgt, k_feat, k_trip, k_model = jax.random.split(key, 5)

    # Small synthetic graph.
    N, FEAT_DIM = 16, 12
    GCN_IN, GCN_DIM, H_MLP = 32, 32, 32
    N_TRIPLETS = 8

    rand_adj = (jax.random.uniform(k_graph, (N, N)) < 0.25).astype(jnp.float32)
    eye = jnp.eye(N, dtype=jnp.float32)
    adj01 = jnp.clip(rand_adj + eye, 0.0, 1.0)          # structural adj + self-loops
    raw_w = jax.random.uniform(k_wgt, (N, N), minval=0.1, maxval=1.0)
    adjw = rand_adj * raw_w * (1.0 - eye) + eye         # weighted adj, self-loop w=1

    feats = jax.random.normal(k_feat, (N, FEAT_DIM), jnp.float32)
    triplets = jax.random.randint(k_trip, (N_TRIPLETS, 3), 0, N)

    enc = Encoder(feats, GCN_in_dim=GCN_IN, gcn_dim=GCN_DIM, h_mlp_dim=H_MLP,
                  key=k_model)
    weights, embedding = enc.forward(adj01, adjw, feats, triplets,
                                     use_weighted_edge=True)
    weights, embedding = jax.block_until_ready((weights, embedding))

    assert embedding.shape == (N, GCN_DIM), embedding.shape
    assert weights.shape == (N_TRIPLETS, 1), weights.shape

    ref_w, ref_e = reference_forward(enc, adj01, adjw, feats, triplets, True)
    assert bool(jnp.all(jnp.isfinite(embedding))) and bool(jnp.all(jnp.isfinite(weights)))
    assert jnp.allclose(embedding, ref_e, rtol=0.1, atol=0.1), "embedding mismatch"
    assert jnp.allclose(weights, ref_w, rtol=0.1, atol=0.1), "edge-score mismatch"
    print("KERNEL_OK")
</pallas_src>

<mosaic_0001>
module attributes {stable_mosaic.version = 11 : i64} {
  func.func @_dense_stack_kernel(%arg0: i32, %arg1: memref<128x128xbf16, #tpu.memory_space<vmem>>, %arg2: memref<128x128xbf16, #tpu.memory_space<vmem>>, %arg3: memref<1x128xf32, #tpu.memory_space<vmem>>, %arg4: memref<128x128xbf16, #tpu.memory_space<vmem>>) attributes {dimension_semantics = [#tpu.dimension_semantics<parallel>], iteration_bounds = array<i64: 1>, scalar_prefetch = 0 : i64, scratch_operands = 0 : i64, tpu.core_type = #tpu.core_type<tc>, window_params = [{transform_indices = @transform_0, window_bounds = array<i64: 128, 128>}, {pipeline_mode = #tpu.pipeline_mode<synchronous>, transform_indices = @transform_1, window_bounds = array<i64: 128, 128>}, {pipeline_mode = #tpu.pipeline_mode<synchronous>, transform_indices = @transform_2, window_bounds = array<i64: 1, 128>}, {transform_indices = @transform_3, window_bounds = array<i64: 128, 128>}]} {
    %c0 = arith.constant 0 : index
    %c0_0 = arith.constant 0 : index
    %0 = vector.load %arg1[%c0, %c0_0] : memref<128x128xbf16, #tpu.memory_space<vmem>>, vector<128x128xbf16>
    %c0_1 = arith.constant 0 : index
    %c0_2 = arith.constant 0 : index
    %1 = vector.load %arg2[%c0_1, %c0_2] : memref<128x128xbf16, #tpu.memory_space<vmem>>, vector<128x128xbf16>
    %cst = arith.constant dense<0.000000e+00> : vector<128x128xf32>
    %2 = tpu.matmul %0, %1, %cst {dimension_numbers = #tpu.dot_dimension_numbers<[1], [0], [0], [1], [0, 0, 1, 1], [], []>} : vector<128x128xbf16>, vector<128x128xbf16>, vector<128x128xf32> -> vector<128x128xf32>
    %c0_3 = arith.constant 0 : index
    %c0_4 = arith.constant 0 : index
    %3 = vector.load %arg3[%c0_3, %c0_4] : memref<1x128xf32, #tpu.memory_space<vmem>>, vector<1x128xf32>
    %4 = vector.broadcast %3 : vector<1x128xf32> to vector<128x128xf32>
    %5 = arith.addf %2, %4 : vector<128x128xf32>
    %6 = arith.truncf %5 : vector<128x128xf32> to vector<128x128xbf16>
    %c0_5 = arith.constant 0 : index
    %c0_6 = arith.constant 0 : index
    %7 = vector.load %arg4[%c0_5, %c0_6] : memref<128x128xbf16, #tpu.memory_space<vmem>>, vector<128x128xbf16>
    tpu.vector_store %arg4[%c0_5, %c0_6], %6 {strides = array<i32>} : memref<128x128xbf16, #tpu.memory_space<vmem>>, vector<128x128xbf16>,
    return
  }
  func.func @transform_0(%arg0: i32) -> (i32, i32) {
    %c0_i32 = arith.constant 0 : i32
    %c0_i32_0 = arith.constant 0 : i32
    return %arg0, %c0_i32 : i32, i32
  }
  func.func @transform_1(%arg0: i32) -> (i32, i32) {
    %c0_i32 = arith.constant 0 : i32
    %c0_i32_0 = arith.constant 0 : i32
    %c0_i32_1 = arith.constant 0 : i32
    return %c0_i32, %c0_i32_0 : i32, i32
  }
  func.func @transform_2(%arg0: i32) -> (i32, i32) {
    %c0_i32 = arith.constant 0 : i32
    %c0_i32_0 = arith.constant 0 : i32
    %c0_i32_1 = arith.constant 0 : i32
    return %c0_i32, %c0_i32_0 : i32, i32
  }
  func.func @transform_3(%arg0: i32) -> (i32, i32) {
    %c0_i32 = arith.constant 0 : i32
    %c0_i32_0 = arith.constant 0 : i32
    return %arg0, %c0_i32 : i32, i32
  }
}

</mosaic_0001>

<bundles_post_ra>
// kernel: tpu_custom_call.1
= control target key start
LH: loop header
LB: loop body
LE: loop exit
PB: predicated region body
PF: predicated region fallthrough
CT: control target
= control target key end

     0   :  { %8 = vsyncpa [#allocation3], 0  ;;  %s561_s0 = inlined_call_operand.hbm [shape: bf16[128,128], index: 0, kind: input, shape index: {}]   ;;  %s562_s1 = inlined_call_operand.hbm [shape: bf16[128,128], index: 1, kind: input, shape index: {}]   ;;  %s563_s2 = inlined_call_operand.vmem [shape: f32[1,128], index: 2, kind: input, shape index: {}]   ;;  %s564_s3 = inlined_call_operand.hbm [shape: bf16[128,128], index: 3, kind: output, shape index: {}]  }
   0x1   :  { %9 = vsyncpa [#allocation6], 0 }
   0x2   :  { %10 = vsyncpa [#allocation4], 0  ;;  %s15_s14 = sshll.u32 %s561_s0, 4  ;;  %s515_s15 = smov [#allocation2]   ;;  %s16_s14 = int_to_ptr.hbm [resolvable:$true] %s15_s14 }
   0x3   :  { %s17_s16 = sshll.u32 %s515_s15, 4  ;;  %s28_s19 = sshll.u32 %s562_s1, 4  ;;  %s18_s16 = int_to_ptr.vmem [resolvable:$true] %s17_s16  ;;  %s29_s19 = int_to_ptr.hbm [resolvable:$true] %s28_s19 }
   0x4   :  { %s516_s20 = smov 64   ;;  %s517_s21 = smov 4  }
   0x5   :  { %23 = dma.hbm_to_vmem [thread:$0]  %s16_s14, 1024, %s18_s16, [#allocation3], %s516_s20, %s516_s20, %s517_s21  }
   0x6   :  { %s518_s22 = smov [#allocation5]  }
   0x7   :  { %s30_s23 = sshll.u32 %s518_s22, 4  ;;  %s31_s23 = int_to_ptr.vmem [resolvable:$true] %s30_s23 }
   0x8   :  { %36 = dma.hbm_to_vmem [thread:$0]  %s29_s19, 1024, %s31_s23, [#allocation6], %s516_s20, %s516_s20, %s517_s21  }
   0x9   :  { %509 = dma.done.wait [#allocation3], 1024  }
   0xa   :  { %510 = vsyncadd [#allocation3], 4294966272 }
   0xb   :  { %511 = dma.done.wait [#allocation6], 1024  }
   0xc   :  { %512 = vsyncadd [#allocation6], 4294966272  ;;  %v359_v0 = vld [vmem:[#allocation5 + $0x38] sm:$0xff]  ;;  %v358_v1 = vld [vmem:[#allocation5 + $0x30] sm:$0xff]  ;;  %s266_s27 = sshll.u32 %s564_s3, 4  ;;  %s267_s27 = int_to_ptr.hbm [resolvable:$true] %s266_s27 }
   0xd   :  { %179 = vmatpush.bf16.msra.mxu0 %v359_v0  ;;  %407 = vmatpush.bf16.msra.mxu1 %v359_v0  ;;  %v357_v2 = vld [vmem:[#allocation5 + $0x28] sm:$0xff]  ;;  %v356_v3 = vld [vmem:[#allocation5 + $0x20] sm:$0xff]  ;;  %v355_v4 = vld [vmem:[#allocation5 + $0x18] sm:$0xff] }
   0xe   :  { %408 = vmatpush.bf16.msra.mxu2 %v359_v0  ;;  %409 = vmatpush.bf16.msra.mxu3 %v359_v0  ;;  %v354_v5 = vld [vmem:[#allocation5 + $0x10] sm:$0xff]  ;;  %v353_v6 = vld [vmem:[#allocation5 + $0x8] sm:$0xff]  ;;  %v352_v7 = vld [vmem:[#allocation5] sm:$0xff] }
   0xf   :  { %v344_v8 = vld [vmem:[#allocation2] sm:$0xff]  ;;  %v346_v9 = vld [vmem:[#allocation2 + $0x10] sm:$0xff]  ;;  %v345_v12 = vld [vmem:[#allocation2 + $0x8] sm:$0xff] }
  0x10   :  { %v348_v10 = vld [vmem:[#allocation2 + $0x20] sm:$0xff]  ;;  %v350_v11 = vld [vmem:[#allocation2 + $0x30] sm:$0xff]  ;;  %v347_v13 = vld [vmem:[#allocation2 + $0x18] sm:$0xff] }
  0x11   :  { %180 = vmatpush.bf16.msra.mxu0 %v358_v1  ;;  %410 = vmatpush.bf16.msra.mxu1 %v358_v1  ;;  %v349_v14 = vld [vmem:[#allocation2 + $0x28] sm:$0xff]  ;;  %v351_v15 = vld [vmem:[#allocation2 + $0x38] sm:$0xff]  ;;  %v436_v18 = vld [vmem:[%s563_s2] ss:$0 sm:$0xff]  ;;  %s519_s2 = smov [#allocation7]  }
  0x12   :  { %411 = vmatpush.bf16.msra.mxu2 %v358_v1  ;;  %412 = vmatpush.bf16.msra.mxu3 %v358_v1  ;;  %s264_s24 = sshll.u32 %s519_s2, 4  ;;  %s265_s24 = int_to_ptr.vmem [resolvable:$true] %s264_s24 }
  0x15   :  { %181 = vmatpush.bf16.msra.mxu0 %v357_v2  ;;  %413 = vmatpush.bf16.msra.mxu1 %v357_v2 }
  0x16   :  { %414 = vmatpush.bf16.msra.mxu2 %v357_v2  ;;  %415 = vmatpush.bf16.msra.mxu3 %v357_v2 }
  0x19   :  { %182 = vmatpush.bf16.msra.mxu0 %v356_v3  ;;  %416 = vmatpush.bf16.msra.mxu1 %v356_v3 }
  0x1a   :  { %417 = vmatpush.bf16.msra.mxu2 %v356_v3  ;;  %418 = vmatpush.bf16.msra.mxu3 %v356_v3 }
  0x1d   :  { %183 = vmatpush.bf16.msra.mxu0 %v355_v4  ;;  %419 = vmatpush.bf16.msra.mxu1 %v355_v4 }
  0x1e   :  { %420 = vmatpush.bf16.msra.mxu2 %v355_v4  ;;  %421 = vmatpush.bf16.msra.mxu3 %v355_v4 }
  0x21   :  { %184 = vmatpush.bf16.msra.mxu0 %v354_v5  ;;  %422 = vmatpush.bf16.msra.mxu1 %v354_v5 }
  0x22   :  { %423 = vmatpush.bf16.msra.mxu2 %v354_v5  ;;  %424 = vmatpush.bf16.msra.mxu3 %v354_v5 }
  0x25   :  { %185 = vmatpush.bf16.msra.mxu0 %v353_v6  ;;  %425 = vmatpush.bf16.msra.mxu1 %v353_v6 }
  0x26   :  { %426 = vmatpush.bf16.msra.mxu2 %v353_v6  ;;  %427 = vmatpush.bf16.msra.mxu3 %v353_v6 }
  0x29   :  { %186 = vmatpush.bf16.msra.mxu0 %v352_v7  ;;  %428 = vmatpush.bf16.msra.mxu1 %v352_v7 }
  0x2a   :  { %429 = vmatpush.bf16.msra.mxu2 %v352_v7  ;;  %430 = vmatpush.bf16.msra.mxu3 %v352_v7 }
  0x2c   :  { %187 = vmatmul.bf16.vlgmr.msra.gmra.mxu0 %v344_v8  ;;  %197 = vmatmul.bf16.vlgmr.msra.gmra.mxu1 %v346_v9 }
  0x2d   :  { %207 = vmatmul.bf16.vlgmr.msra.gmra.mxu2 %v348_v10  ;;  %217 = vmatmul.bf16.vlgmr.msra.gmra.mxu3 %v350_v11 }
  0x3c   :  { %192 = vmatmul.bf16.gmra.mxu0 %v345_v12  ;;  %202 = vmatmul.bf16.gmra.mxu1 %v347_v13 }
  0x3d   :  { %212 = vmatmul.bf16.gmra.mxu2 %v349_v14  ;;  %222 = vmatmul.bf16.gmra.mxu3 %v351_v15 }
  0xa9   :  { %v188_v16 = vpop.f32.mrf.mxu0  ;;  %v198_v17 = vpop.f32.mrf.mxu1 }
  0xaa   :  { %v189_v23 = vadd.f32 %v436_v18, %v188_v16  ;;  %v199_v24 = vadd.f32 %v436_v18, %v198_v17 }
  0xb0   :  { %v208_v19 = vpop.f32.mrf.mxu2  ;;  %v218_v20 = vpop.f32.mrf.mxu3 }
  0xb1   :  { %v190_v21 = vpop.f32.mrf.mxu0  ;;  %v200_v22 = vpop.f32.mrf.mxu1  ;;  %v209_v31 = vadd.f32 %v436_v18, %v208_v19  ;;  %v219_v32 = vadd.f32 %v436_v18, %v218_v20 }
  0xb2   :  { %v191_v25 = vadd.f32 %v436_v18, %v190_v21  ;;  %v201_v26 = vadd.f32 %v436_v18, %v200_v22 }
  0xb4   :  { %v363_v27 = vpack.c.bf16 %v191_v25, %v189_v23  ;;  %v373_v28 = vpack.c.bf16 %v201_v26, %v199_v24 }
  0xb6   :  { %364 = vst [vmem:[#allocation7] sm:$0xff] %v363_v27  }
  0xb7   :  { %401 = vst [vmem:[#allocation7 + $0x10] sm:$0xff] %v373_v28  }
  0xb8   :  { %v210_v29 = vpop.f32.mrf.mxu2  ;;  %v220_v30 = vpop.f32.mrf.mxu3 }
  0xb9   :  { %v211_v33 = vadd.f32 %v436_v18, %v210_v29  ;;  %v221_v34 = vadd.f32 %v436_v18, %v220_v30  ;;  %v193_v35 = vpop.f32.mrf.mxu0  ;;  %v203_v36 = vpop.f32.mrf.mxu1 }
  0xba   :  { %v194_v43 = vadd.f32 %v436_v18, %v193_v35  ;;  %v204_v44 = vadd.f32 %v436_v18, %v203_v36 }
  0xbb   :  { %v383_v37 = vpack.c.bf16 %v211_v33, %v209_v31  ;;  %v393_v38 = vpack.c.bf16 %v221_v34, %v219_v32 }
  0xbd   :  { %403 = vst [vmem:[#allocation7 + $0x20] sm:$0xff] %v383_v37  }
  0xbe   :  { %405 = vst [vmem:[#allocation7 + $0x30] sm:$0xff] %v393_v38  }
  0xc0   :  { %v213_v39 = vpop.f32.mrf.mxu2  ;;  %v223_v40 = vpop.f32.mrf.mxu3 }
  0xc1   :  { %v195_v41 = vpop.f32.mrf.mxu0  ;;  %v205_v42 = vpop.f32.mrf.mxu1  ;;  %v214_v51 = vadd.f32 %v436_v18, %v213_v39  ;;  %v224_v52 = vadd.f32 %v436_v18, %v223_v40 }
  0xc2   :  { %v196_v45 = vadd.f32 %v436_v18, %v195_v41  ;;  %v206_v46 = vadd.f32 %v436_v18, %v205_v42 }
  0xc4   :  { %v368_v47 = vpack.c.bf16 %v196_v45, %v194_v43  ;;  %v378_v48 = vpack.c.bf16 %v206_v46, %v204_v44 }
  0xc6   :  { %400 = vst [vmem:[#allocation7 + $0x8] sm:$0xff] %v368_v47  }
  0xc7   :  { %402 = vst [vmem:[#allocation7 + $0x18] sm:$0xff] %v378_v48  }
  0xc8   :  { %v215_v49 = vpop.f32.mrf.mxu2  ;;  %v225_v50 = vpop.f32.mrf.mxu3 }
  0xc9   :  { %v216_v53 = vadd.f32 %v436_v18, %v215_v49  ;;  %v226_v54 = vadd.f32 %v436_v18, %v225_v50 }
  0xcb   :  { %v388_v55 = vpack.c.bf16 %v216_v53, %v214_v51  ;;  %v398_v56 = vpack.c.bf16 %v226_v54, %v224_v52 }
  0xcd   :  { %404 = vst [vmem:[#allocation7 + $0x28] sm:$0xff] %v388_v55  }
  0xce   :  { %406 = vst [vmem:[#allocation7 + $0x38] sm:$0xff] %v398_v56  }
  0xcf   :  { %272 = dma.vmem_to_hbm [thread:$0]  %s265_s24, 1024, %s267_s27, [#allocation4], %s516_s20, %s516_s20, %s517_s21  }
  0xd0   :  { %513 = dma.done.wait [#allocation4], 1024  }
  0xd1   :  { %514 = vsyncadd [#allocation4], 4294966272 }
  0xd2   :  { %277 = vsyncpa [#allocation3], 1 }
  0xd3   :  { %278 = vsyncpa [#allocation6], 1 }
  0xd4   :  { %279 = vsyncpa [#allocation4], 1 }

</bundles_post_ra>
